<compile_context>
chip_gen: v5e
topology: v5e:2x2
jax: 0.10.0
libtpu: 0.0.40
codegen_flags: <defaults>
</compile_context>

<pallas_src>
import functools

import jax
import jax.numpy as jnp
from jax.experimental import pallas as pl
from jax.experimental.pallas import tpu as pltpu


def _round_up(x, m):
    return ((x + m - 1) // m) * m


def _vmem_capacity_bytes():
    """Per-core VMEM capacity; conservative (v7x-sized) fallback."""
    try:
        info = pltpu.get_tpu_info()
        cap = getattr(info, "vmem_capacity_bytes", None)
        if cap:
            return int(cap)
    except Exception:
        pass
    return 64 << 20


def _linear_bias_kernel(x_ref, w_ref, b_ref, o_ref, *, compute_dtype):
    # x_ref: (tile_m, D) in caller dtype, w_ref: (D, tile_n) compute dtype,
    # b_ref: (1, tile_n) f32, o_ref: (tile_m, tile_n) out dtype.
    x = x_ref[...]
    if x.dtype != compute_dtype:
        x = x.astype(compute_dtype)       # tile-wise cast: no wrapper pass over x
    acc = jnp.dot(x, w_ref[...], preferred_element_type=jnp.float32)
    o_ref[...] = (acc + b_ref[...]).astype(o_ref.dtype)


def _choose_tiles(M, D, N, x_isz, w_isz, out_isz, budget):
    """Pick (tile_m, tile_n) fitting `budget`. Shrink tile_m first; splitting
    the feature axis is a last resort (extra N tiles re-stream an operand)."""

    def footprint(tm, tn):
        # BlockSpec double-buffers every operand (2x), even resident ones.
        return 2 * (tm * D * x_isz          # activation tile (caller dtype)
                    + D * tn * w_isz        # weight tile (compute dtype)
                    + tn * 4                # bias tile (f32)
                    + tm * tn * out_isz)    # output tile

    tile_m = min(512, _round_up(M, 8))   # 512: multiple of 256 (v6e/v7x) & 128 (v5e)
    tile_n = N                           # full-dim feature tile is always layout-legal

    while footprint(tile_m, tile_n) > budget and tile_m > 128:
        tile_m = max(128, tile_m // 2)
    while footprint(tile_m, tile_n) > budget and tile_m > 8:
        tile_m = max(8, _round_up(tile_m // 2, 8))
    if footprint(tile_m, tile_n) > budget and N > 128:
        tile_n = _round_up(N, 128)
        while footprint(tile_m, tile_n) > budget and tile_n > 128:
            tile_n = max(128, _round_up(tile_n // 2, 128))
    return tile_m, tile_n


@functools.partial(
    jax.jit,
    static_argnames=("num_streams", "num_tokens", "tile_m", "compute_dtype",
                     "out_dtype"))
def frame_level_classification_head(x, weight_t, bias, *, num_streams, num_tokens,
                                    tile_m=None, compute_dtype=jnp.bfloat16,
                                    out_dtype=None):
    """x: (B, T, D); weight_t: (D, S*K) (transposed vs torch's (out, in)); bias: (S*K,).

    Pre-cast weight_t to `compute_dtype` at parameter init for best performance
    (the per-call cast is skipped when dtypes already match).
    Returns probs of shape (B, T, num_streams, num_tokens), dtype = out_dtype
    (defaults to x.dtype).
    """
    B, T, D = x.shape
    N = num_streams * num_tokens
    M = B * T
    if out_dtype is None:
        out_dtype = x.dtype

    # Reshape is free; no astype / pad passes over x.
    x2d = x.reshape(M, D)
    w_c = weight_t if weight_t.dtype == compute_dtype else weight_t.astype(compute_dtype)
    b_c = bias.astype(jnp.float32).reshape(1, N)

    x_isz = jnp.dtype(x2d.dtype).itemsize
    w_isz = jnp.dtype(compute_dtype).itemsize
    o_isz = jnp.dtype(out_dtype).itemsize

    # Generation-aware tile budget: ~75% of per-core VMEM, always leaving headroom.
    vmem_cap = _vmem_capacity_bytes()
    budget = min(int(vmem_cap * 0.75), vmem_cap - (16 << 20))

    auto_tm, tile_n = _choose_tiles(M, D, N, x_isz, w_isz, o_isz, budget)
    if tile_m is None:
        tile_m = auto_tm
    else:
        tile_m = max(8, _round_up(int(tile_m), 8))

    n_m = pl.cdiv(M, tile_m)
    n_n = pl.cdiv(N, tile_n)

    # Grid ordering: keep the row (M) axis as the megacore-sharded "parallel"
    # axis.  If N must be split, pick the ordering that re-streams the smaller
    # operand: M-outer re-reads the weight once per row tile, N-outer re-reads
    # x once per feature tile.
    w_restream = (n_m - 1) * D * N * w_isz
    x_restream = (n_n - 1) * M * D * x_isz
    m_outer = (n_n == 1) or (w_restream <= x_restream)

    if m_outer:
        grid = (n_m, n_n)
        in_specs = [
            pl.BlockSpec((tile_m, D), lambda i, j: (i, 0)),   # activations (stream)
            pl.BlockSpec((D, tile_n), lambda i, j: (0, j)),   # weight (resident if n_n==1)
            pl.BlockSpec((1, tile_n), lambda i, j: (0, j)),   # bias
        ]
        out_spec = pl.BlockSpec((tile_m, tile_n), lambda i, j: (i, j))
        dims = ("parallel", "arbitrary")
        x_bytes = M * D * x_isz
        w_bytes = D * N * w_isz * (n_m if n_n > 1 else 1)
    else:
        grid = (n_n, n_m)
        in_specs = [
            pl.BlockSpec((tile_m, D), lambda j, i: (i, 0)),
            pl.BlockSpec((D, tile_n), lambda j, i: (0, j)),
            pl.BlockSpec((1, tile_n), lambda j, i: (0, j)),
        ]
        out_spec = pl.BlockSpec((tile_m, tile_n), lambda j, i: (i, j))
        dims = ("arbitrary", "parallel")
        x_bytes = M * D * x_isz * n_n
        w_bytes = D * N * w_isz

    footprint = 2 * (tile_m * D * x_isz + D * tile_n * w_isz
                     + tile_n * 4 + tile_m * tile_n * o_isz)
    # In-kernel temporaries: compute-dtype copy of the x tile + f32 accumulator.
    scratch = tile_m * D * w_isz + tile_m * tile_n * 4
    vmem_limit = int(min(footprint + scratch + (4 << 20), vmem_cap - (8 << 20)))
    vmem_limit = max(vmem_limit, 16 << 20)

    cost = pl.CostEstimate(
        flops=2 * M * N * D,
        transcendentals=0,
        bytes_accessed=x_bytes + w_bytes + N * 4 + M * N * o_isz,
    )

    out2d = pl.pallas_call(
        functools.partial(_linear_bias_kernel, compute_dtype=compute_dtype),
        out_shape=jax.ShapeDtypeStruct((M, N), out_dtype),   # true shape: no slice pass
        grid_spec=pltpu.PrefetchScalarGridSpec(
            num_scalar_prefetch=0,
            grid=grid,
            in_specs=in_specs,
            out_specs=out_spec,
        ),
        compiler_params=pltpu.CompilerParams(
            dimension_semantics=dims,
            vmem_limit_bytes=vmem_limit,
        ),
        cost_estimate=cost,
    )(x2d, w_c, b_c)

    return out2d.reshape(B, T, num_streams, num_tokens)


def _reference(x, weight_t, bias, num_streams, num_tokens, compute_dtype):
    """Same math, plain JAX: compute-dtype matmul, f32 accumulation, f32 bias add."""
    B, T, D = x.shape
    y = jnp.dot(x.reshape(B * T, D).astype(compute_dtype),
                weight_t.astype(compute_dtype),
                preferred_element_type=jnp.float32)
    y = (y + bias.astype(jnp.float32)).astype(x.dtype)
    return y.reshape(B, T, num_streams, num_tokens)


if __name__ == "__main__":
    key = jax.random.PRNGKey(0)

    # ---- Test 1: module-consistent small shapes, N a multiple of 128 ----
    B, T = 2, 8
    model_dim = 32
    num_tokens, num_streams = 16, 8
    N = num_tokens * num_streams  # 128

    kx, kw, kb, key = jax.random.split(key, 4)
    x = jax.random.normal(kx, (B, T, model_dim), dtype=jnp.float32)
    weight_t = (jax.random.normal(kw, (model_dim, N), dtype=jnp.float32)
                / jnp.sqrt(jnp.float32(model_dim)))
    bias = jax.random.normal(kb, (N,), dtype=jnp.float32) * 0.01
    # Parameter-init-time cast (per perf review): one-time, not per forward call.
    weight_bf16 = weight_t.astype(jnp.bfloat16)

    probs = frame_level_classification_head(
        x, weight_bf16, bias, num_streams=num_streams, num_tokens=num_tokens)
    probs = jax.block_until_ready(probs)
    assert probs.shape == (B, T, num_streams, num_tokens)

    ref = _reference(x, weight_bf16, bias, num_streams, num_tokens, jnp.bfloat16)
    assert jnp.allclose(probs, ref, atol=1e-4, rtol=1e-4)
    # Loose sanity check vs full-f32 math (bf16 rounding only).
    ref_f32 = (x.reshape(B * T, model_dim) @ weight_t + bias).reshape(
        B, T, num_streams, num_tokens)
    assert jnp.allclose(probs, ref_f32, atol=8e-2, rtol=8e-2)

    # ---- Test 2: ragged M and N (cdiv grid, masked edge loads/stores, multi-tile) ----
    B2, T2 = 2, 37
    nt2, ns2 = 10, 4                    # N = 40 (not a multiple of 128)
    N2 = nt2 * ns2
    kx, kw, kb, key = jax.random.split(key, 4)
    x2 = jax.random.normal(kx, (B2, T2, model_dim), dtype=jnp.float32)
    w2 = (jax.random.normal(kw, (model_dim, N2), dtype=jnp.float32)
          / jnp.sqrt(jnp.float32(model_dim)))
    b2 = jax.random.normal(kb, (N2,), dtype=jnp.float32) * 0.01
    w2_bf16 = w2.astype(jnp.bfloat16)

    probs2 = frame_level_classification_head(
        x2, w2_bf16, b2, num_streams=ns2, num_tokens=nt2, tile_m=16)  # 5 row tiles, ragged last
    probs2 = jax.block_until_ready(probs2)
    assert probs2.shape == (B2, T2, ns2, nt2)

    ref2 = _reference(x2, w2_bf16, b2, ns2, nt2, jnp.bfloat16)
    assert jnp.allclose(probs2, ref2, atol=1e-4, rtol=1e-4)

    print("KERNEL_OK")
</pallas_src>

<mosaic_0001>
module attributes {stable_mosaic.version = 11 : i64} {
  func.func @_linear_bias_kernel(%arg0: i32, %arg1: i32, %arg2: memref<16x32xf32, #tpu.memory_space<vmem>>, %arg3: memref<32x128xbf16, #tpu.memory_space<vmem>>, %arg4: memref<1x128xf32, #tpu.memory_space<vmem>>, %arg5: memref<16x128xf32, #tpu.memory_space<vmem>>) attributes {dimension_semantics = [#tpu.dimension_semantics<parallel>, #tpu.dimension_semantics<arbitrary>], iteration_bounds = array<i64: 1, 1>, scalar_prefetch = 0 : i64, scratch_operands = 0 : i64, tpu.core_type = #tpu.core_type<tc>, window_params = [{transform_indices = @transform_0, window_bounds = array<i64: 16, 32>}, {transform_indices = @transform_1, window_bounds = array<i64: 32, 128>}, {transform_indices = @transform_2, window_bounds = array<i64: 1, 128>}, {transform_indices = @transform_3, window_bounds = array<i64: 16, 128>}]} {
    %c0 = arith.constant 0 : index
    %c0_0 = arith.constant 0 : index
    %0 = vector.load %arg2[%c0, %c0_0] : memref<16x32xf32, #tpu.memory_space<vmem>>, vector<16x32xf32>
    %1 = arith.truncf %0 : vector<16x32xf32> to vector<16x32xbf16>
    %c0_1 = arith.constant 0 : index
    %c0_2 = arith.constant 0 : index
    %2 = vector.load %arg3[%c0_1, %c0_2] : memref<32x128xbf16, #tpu.memory_space<vmem>>, vector<32x128xbf16>
    %cst = arith.constant dense<0.000000e+00> : vector<16x128xf32>
    %3 = tpu.matmul %1, %2, %cst {dimension_numbers = #tpu.dot_dimension_numbers<[1], [0], [0], [1], [0, 0, 1, 1], [], []>} : vector<16x32xbf16>, vector<32x128xbf16>, vector<16x128xf32> -> vector<16x128xf32>
    %c0_3 = arith.constant 0 : index
    %c0_4 = arith.constant 0 : index
    %4 = vector.load %arg4[%c0_3, %c0_4] : memref<1x128xf32, #tpu.memory_space<vmem>>, vector<1x128xf32>
    %5 = vector.broadcast %4 : vector<1x128xf32> to vector<16x128xf32>
    %6 = arith.addf %3, %5 : vector<16x128xf32>
    %c0_5 = arith.constant 0 : index
    %c0_6 = arith.constant 0 : index
    %7 = vector.load %arg5[%c0_5, %c0_6] : memref<16x128xf32, #tpu.memory_space<vmem>>, vector<16x128xf32>
    tpu.vector_store %arg5[%c0_5, %c0_6], %6 {strides = array<i32>} : memref<16x128xf32, #tpu.memory_space<vmem>>, vector<16x128xf32>,
    return
  }
  func.func @transform_0(%arg0: i32, %arg1: i32) -> (i32, i32) {
    %c0_i32 = arith.constant 0 : i32
    %c0_i32_0 = arith.constant 0 : i32
    return %arg0, %c0_i32 : i32, i32
  }
  func.func @transform_1(%arg0: i32, %arg1: i32) -> (i32, i32) {
    %c0_i32 = arith.constant 0 : i32
    %c0_i32_0 = arith.constant 0 : i32
    return %c0_i32, %arg1 : i32, i32
  }
  func.func @transform_2(%arg0: i32, %arg1: i32) -> (i32, i32) {
    %c0_i32 = arith.constant 0 : i32
    %c0_i32_0 = arith.constant 0 : i32
    return %c0_i32, %arg1 : i32, i32
  }
  func.func @transform_3(%arg0: i32, %arg1: i32) -> (i32, i32) {
    %c0_i32 = arith.constant 0 : i32
    return %arg0, %arg1 : i32, i32
  }
}

</mosaic_0001>

<bundles_post_ra>
// kernel: frame_level_classification_head.1
= control target key start
LH: loop header
LB: loop body
LE: loop exit
PB: predicated region body
PF: predicated region fallthrough
CT: control target
= control target key end

     0   :  { %8 = vsyncpa [#allocation3], 0  ;;  %s207_s0 = inlined_call_operand.hbm [shape: f32[16,32], index: 0, kind: input, shape index: {}]   ;;  %s208_s1 = inlined_call_operand.hbm [shape: bf16[32,128], index: 1, kind: input, shape index: {}]   ;;  %s209_s2 = inlined_call_operand.vmem [shape: f32[1,128], index: 2, kind: input, shape index: {}]   ;;  %s210_s3 = inlined_call_operand.vmem [shape: f32[16,128], index: 3, kind: output, shape index: {}]  }
   0x1   :  { %s14_s14 = sshll.u32 %s207_s0, 4  ;;  %s15_s14 = int_to_ptr.hbm [resolvable:$true] %s14_s14 }
   0x2   :  { %9 = vsyncpa [#allocation5], 0  ;;  %s166_s15 = smov [#allocation2]   ;;  %s27_s19 = sshll.u32 %s208_s1, 4  ;;  %s28_s19 = int_to_ptr.hbm [resolvable:$true] %s27_s19 }
   0x3   :  { %s16_s16 = sshll.u32 %s166_s15, 4  ;;  %s167_s20 = smov 128   ;;  %s17_s16 = int_to_ptr.vmem [resolvable:$true] %s16_s16 }
   0x4   :  { %s168_s21 = smov 8   ;;  %s169_s22 = smov [#allocation4]  }
   0x5   :  { %22 = dma.hbm_to_vmem [thread:$0]  %s15_s14, 256, %s17_s16, [#allocation3], %s167_s20, %s167_s20, %s168_s21  }
   0x6   :  { %s29_s23 = sshll.u32 %s169_s22, 4  ;;  %s170_s24 = smov 64   ;;  %s30_s23 = int_to_ptr.vmem [resolvable:$true] %s29_s23 }
   0x7   :  { %s171_s25 = smov 4  }
   0x8   :  { %35 = dma.hbm_to_vmem [thread:$0]  %s28_s19, 256, %s30_s23, [#allocation5], %s170_s24, %s170_s24, %s171_s25  }
   0x9   :  { %162 = dma.done.wait [#allocation3], 256  }
   0xa   :  { %163 = vsyncadd [#allocation3], 4294967040 }
   0xb   :  { %164 = dma.done.wait [#allocation5], 256  }
   0xc   :  { %165 = vsyncadd [#allocation5], 4294967040  ;;  %v106_v0 = vld [vmem:[#allocation4 + $0x8] sm:$0xff]  ;;  %v105_v1 = vld [vmem:[#allocation4] sm:$0xff]  ;;  %vm70_vm0 = vcmask 261120  }
   0xd   :  { %80 = vmatpush.bf16.msra.mxu0 %v106_v0  ;;  %v47_v2 = vld [vmem:[#allocation2] sm:$0xff]  ;;  %v48_v3 = vld [vmem:[#allocation2 + $0x8] sm:$0xff] }
   0xe   :  { %v49_v4 = vpack.c.bf16 %v48_v3, %v47_v2  ;;  %v113_v5 = vld [vmem:[%s209_s2] ss:$0 sm:$0xff] }
  0x11   :  { %81 = vmatpush.bf16.msra.mxu0 %v105_v1 }
  0x14   :  { %104 = vmatmul.msk.bf16.vlgmr.msra.gmra.mxu0 %vm70_vm0, %v49_v4 }
  0x91   :  { %v83_v6 = vpop.f32.mrf.mxu0 }
  0x92   :  { %v84_v7 = vadd.f32 %v113_v5, %v83_v6 }
  0x94   :  { %88 = vst [vmem:[%s210_s3] sm:$0xff] %v84_v7 }
  0x99   :  { %v85_v8 = vpop.f32.mrf.mxu0 }
  0x9a   :  { %v86_v9 = vadd.f32 %v113_v5, %v85_v8 }
  0x9c   :  { %89 = vst [vmem:[%s210_s3 + $0x8] sm:$0xff] %v86_v9 }
  0x9d   :  { %94 = vsyncpa [#allocation3], 1 }
  0x9e   :  { %95 = vsyncpa [#allocation5], 1 }

</bundles_post_ra>
